<compile_context>
chip_gen: v7x
topology: tpu7x:2x2x1
jax: 0.10.0
libtpu: 0.0.40
codegen_flags: <defaults>
</compile_context>

<pallas_src>
import jax
import jax.numpy as jnp
from jax.experimental import pallas as pl
from jax.experimental.pallas import tpu as pltpu


# ---------------------------------------------------------------------------
# Kernel
# ---------------------------------------------------------------------------
def _fusion_kernel(
    img_ref, txt_ref,
    w1i_ref, w1t_ref, b1_ref,            # alphas first linear (split over concat axis)
    w2_ref, b2_ref,                      # alphas second linear (padded to 128 cols)
    wi_ref, bi_ref,                      # img_proj  (padded to Cp cols)
    wt_ref, bt_ref,                      # txt_proj  (padded to Cp cols)
    wp1_ref, bp1_ref, wp2_ref, bp2_ref,  # post_process (padded to Cp x Cp)
    out_ref, alphas_ref,
):
    img = img_ref[...]   # (TILE_B, Di) compute dtype (bf16)
    txt = txt_ref[...]   # (TILE_B, Dt)

    # alphas = sigmoid(Linear(ReLU(Linear(concat([img, txt])))))
    # concat([img, txt]) @ W1  ==  img @ W1[:Di] + txt @ W1[Di:]
    h = (jnp.dot(img, w1i_ref[...], preferred_element_type=jnp.float32)
         + jnp.dot(txt, w1t_ref[...], preferred_element_type=jnp.float32)
         + b1_ref[...])
    h = jnp.maximum(h, 0.0)                                        # ReLU (dropout=identity)
    logits = jnp.dot(h.astype(w2_ref.dtype), w2_ref[...],
                     preferred_element_type=jnp.float32) + b2_ref[...]
    alphas = jax.nn.sigmoid(logits)                                # (TILE_B, 128); cols 0:2 real
    alphas_ref[...] = alphas.astype(alphas_ref.dtype)

    # projections (padded columns of wi/wt/bi/bt are zero, so they do not perturb the norm)
    img_p = jnp.dot(img, wi_ref[...], preferred_element_type=jnp.float32) + bi_ref[...]
    txt_p = jnp.dot(txt, wt_ref[...], preferred_element_type=jnp.float32) + bt_ref[...]

    # L2 normalize along dim=1 (torch F.normalize, eps=1e-12) via rsqrt, fuse alphas scale.
    inv_img = jax.lax.rsqrt(
        jnp.maximum(jnp.sum(img_p * img_p, axis=1, keepdims=True), 1e-24))
    inv_txt = jax.lax.rsqrt(
        jnp.maximum(jnp.sum(txt_p * txt_p, axis=1, keepdims=True), 1e-24))
    fused = (img_p * (alphas[:, 0:1] * inv_img)
             + txt_p * (alphas[:, 1:2] * inv_txt))                 # (TILE_B, Cp) f32

    # post_process: Linear -> ReLU -> (Dropout=identity) -> Linear
    h2 = jnp.maximum(
        jnp.dot(fused.astype(wp1_ref.dtype), wp1_ref[...],
                preferred_element_type=jnp.float32) + bp1_ref[...],
        0.0)
    out = jnp.dot(h2.astype(wp2_ref.dtype), wp2_ref[...],
                  preferred_element_type=jnp.float32) + bp2_ref[...]
    out_ref[...] = out.astype(out_ref.dtype)


# ---------------------------------------------------------------------------
# Wrapper
# ---------------------------------------------------------------------------
def _round_up(n, m):
    return ((n + m - 1) // m) * m


def _pad2d(x, rows, cols):
    r, c = x.shape
    if r == rows and c == cols:
        return x
    return jnp.pad(x, ((0, rows - r), (0, cols - c)))


def feature_fusion_weighted(img_feat, txt_feat, params, *,
                            tile_b=256, compute_dtype=jnp.bfloat16):
    """Pallas implementation of FeatureFusion(mode='weighted').forward (eval mode)."""
    B, Di = img_feat.shape
    Dt = txt_feat.shape[1]
    C = params["wi"].shape[1]
    H = params["w1i"].shape[1]
    Cp = _round_up(C, 128)     # lane-dense common-space width
    A = 128                    # lane-dense alphas width (real width = 2)

    # Batch tiling: biggest tile that does not over-pad tiny batches
    # (sublane multiple of 8 so the block satisfies the (8, 128) rule).
    tile_b = min(tile_b, _round_up(B, 8))
    pB = _round_up(B, tile_b)
    grid = (pB // tile_b,)

    cdt = jnp.dtype(compute_dtype)

    # Activations: pad batch, cast matmul operands to bf16.
    img_in = _pad2d(img_feat, pB, Di).astype(cdt)
    txt_in = _pad2d(txt_feat, pB, Dt).astype(cdt)

    # Weights: bf16 for MXU operands; biases stay f32 (added post-accumulation).
    # Zero-pad output widths to lane-dense multiples of 128.
    w1i = params["w1i"].astype(cdt)
    w1t = params["w1t"].astype(cdt)
    b1 = params["b1"].astype(jnp.float32)
    w2 = _pad2d(params["w2"], H, A).astype(cdt)
    b2 = _pad2d(params["b2"], 1, A).astype(jnp.float32)
    wi = _pad2d(params["wi"], Di, Cp).astype(cdt)
    bi = _pad2d(params["bi"], 1, Cp).astype(jnp.float32)
    wt = _pad2d(params["wt"], Dt, Cp).astype(cdt)
    bt = _pad2d(params["bt"], 1, Cp).astype(jnp.float32)
    wp1 = _pad2d(params["wp1"], Cp, Cp).astype(cdt)
    bp1 = _pad2d(params["bp1"], 1, Cp).astype(jnp.float32)
    wp2 = _pad2d(params["wp2"], Cp, Cp).astype(cdt)
    bp2 = _pad2d(params["bp2"], 1, Cp).astype(jnp.float32)

    weights = (w1i, w1t, b1, w2, b2, wi, bi, wt, bt, wp1, bp1, wp2, bp2)

    def row_spec(shape):     # batch-tiled arrays
        return pl.BlockSpec(shape, lambda i: (i, 0))

    def const_spec(shape):   # VMEM-resident across all grid steps
        return pl.BlockSpec(shape, lambda i: (0, 0))

    in_specs = [row_spec((tile_b, Di)), row_spec((tile_b, Dt))] + \
               [const_spec(w.shape) for w in weights]
    out_specs = (row_spec((tile_b, Cp)), row_spec((tile_b, A)))
    out_shape = (jax.ShapeDtypeStruct((pB, Cp), jnp.float32),
                 jax.ShapeDtypeStruct((pB, A), jnp.float32))

    # VMEM budget: resident weights + double-buffered activation/output tiles +
    # f32 intermediates, with headroom. Clamp into [32 MiB, 64 MiB] so the same
    # setting is valid on v5e/v6e (128 MiB physical, 16/32 MiB default scope)
    # and v7x (64 MiB physical).
    weight_bytes = sum(int(w.size) * w.dtype.itemsize for w in weights)
    act_bytes = 2 * tile_b * (Di + Dt) * cdt.itemsize
    out_bytes = 2 * tile_b * (Cp + A) * 4
    scratch_bytes = tile_b * (H + A + 4 * Cp) * 4
    need = weight_bytes + act_bytes + out_bytes + scratch_bytes
    vmem_limit = int(min(64 * 1024 * 1024,
                         max(32 * 1024 * 1024, 2 * need + (4 << 20))))

    flops = 2 * pB * (Di * H + Dt * H + H * A + Di * Cp + Dt * Cp + 2 * Cp * Cp)
    transcendentals = pB * (A + 2)           # sigmoid exps + 2 rsqrt per row
    bytes_accessed = (int(img_in.size) * cdt.itemsize
                      + int(txt_in.size) * cdt.itemsize
                      + weight_bytes
                      + pB * (Cp + A) * 4)

    out_pad, alphas_pad = pl.pallas_call(
        _fusion_kernel,
        grid=grid,
        in_specs=in_specs,
        out_specs=out_specs,
        out_shape=out_shape,
        compiler_params=pltpu.CompilerParams(
            dimension_semantics=("parallel",),
            vmem_limit_bytes=vmem_limit,
        ),
        cost_estimate=pl.CostEstimate(
            flops=flops,
            transcendentals=transcendentals,
            bytes_accessed=bytes_accessed,
        ),
    )(img_in, txt_in, *weights)

    # Strip batch / lane padding (padded alpha columns are sigmoid(0)=0.5 — dropped here).
    return out_pad[:B, :C], alphas_pad[:B, :2]


# ---------------------------------------------------------------------------
# Parameter init (mimics torch.nn.Linear default: uniform ±1/sqrt(fan_in))
# ---------------------------------------------------------------------------
def _linear_params(key, fan_in, fan_out):
    kw, kb = jax.random.split(key)
    bound = 1.0 / jnp.sqrt(float(fan_in))
    w = jax.random.uniform(kw, (fan_in, fan_out), jnp.float32, -bound, bound)
    b = jax.random.uniform(kb, (1, fan_out), jnp.float32, -bound, bound)
    return w, b


def init_params(key, img_feat_dim, txt_feat_dim, common_space_dim, hidden=512):
    keys = jax.random.split(key, 5)
    w1, b1 = _linear_params(keys[0], img_feat_dim + txt_feat_dim, hidden)
    w2, b2 = _linear_params(keys[1], hidden, 2)
    wi, bi = _linear_params(keys[2], img_feat_dim, common_space_dim)
    wt, bt = _linear_params(keys[3], txt_feat_dim, common_space_dim)
    kp1, kp2 = jax.random.split(keys[4])
    wp1, bp1 = _linear_params(kp1, common_space_dim, common_space_dim)
    wp2, bp2 = _linear_params(kp2, common_space_dim, common_space_dim)
    return {
        "w1i": w1[:img_feat_dim], "w1t": w1[img_feat_dim:], "b1": b1,
        "w2": w2, "b2": b2,
        "wi": wi, "bi": bi,
        "wt": wt, "bt": bt,
        "wp1": wp1, "bp1": bp1, "wp2": wp2, "bp2": bp2,
    }


if __name__ == "__main__":
    B = 2
    img_feat_dim = 32
    txt_feat_dim = 48
    common_space_dim = 32

    key = jax.random.PRNGKey(0)
    k_img, k_txt, k_params = jax.random.split(key, 3)
    img_feat = jax.random.normal(k_img, (B, img_feat_dim), jnp.float32)
    txt_feat = jax.random.normal(k_txt, (B, txt_feat_dim), jnp.float32)
    params = init_params(k_params, img_feat_dim, txt_feat_dim, common_space_dim)

    out_feat, alphas = feature_fusion_weighted(img_feat, txt_feat, params)
    jax.block_until_ready((out_feat, alphas))

    # Pure-JAX f32 reference (eval-mode semantics). Kernel uses bf16 matmul operands
    # with f32 accumulation, so tolerances are loosened accordingly.
    concat = jnp.concatenate([img_feat, txt_feat], axis=1)
    w1 = jnp.concatenate([params["w1i"], params["w1t"]], axis=0)
    h = jnp.maximum(concat @ w1 + params["b1"], 0.0)
    alphas_ref = jax.nn.sigmoid(h @ params["w2"] + params["b2"])
    img_p = img_feat @ params["wi"] + params["bi"]
    txt_p = txt_feat @ params["wt"] + params["bt"]
    img_n = img_p / jnp.maximum(jnp.linalg.norm(img_p, axis=1, keepdims=True), 1e-12)
    txt_n = txt_p / jnp.maximum(jnp.linalg.norm(txt_p, axis=1, keepdims=True), 1e-12)
    fused = img_n * alphas_ref[:, 0:1] + txt_n * alphas_ref[:, 1:2]
    h2 = jnp.maximum(fused @ params["wp1"] + params["bp1"], 0.0)
    out_ref = h2 @ params["wp2"] + params["bp2"]

    assert out_feat.shape == (B, common_space_dim)
    assert alphas.shape == (B, 2)
    assert jnp.allclose(out_feat, out_ref, atol=2e-2, rtol=2e-2), "out_feat mismatch"
    assert jnp.allclose(alphas, alphas_ref, atol=2e-2, rtol=2e-2), "alphas mismatch"
    print("KERNEL_OK")
</pallas_src>

<mosaic_0001>
module attributes {stable_mosaic.version = 11 : i64} {
  func.func @_fusion_kernel(%arg0: i32, %arg1: memref<8x32xbf16, #tpu.memory_space<vmem>>, %arg2: memref<8x48xbf16, #tpu.memory_space<vmem>>, %arg3: memref<32x512xbf16, #tpu.memory_space<vmem>>, %arg4: memref<48x512xbf16, #tpu.memory_space<vmem>>, %arg5: memref<1x512xf32, #tpu.memory_space<vmem>>, %arg6: memref<512x128xbf16, #tpu.memory_space<vmem>>, %arg7: memref<1x128xf32, #tpu.memory_space<vmem>>, %arg8: memref<32x128xbf16, #tpu.memory_space<vmem>>, %arg9: memref<1x128xf32, #tpu.memory_space<vmem>>, %arg10: memref<48x128xbf16, #tpu.memory_space<vmem>>, %arg11: memref<1x128xf32, #tpu.memory_space<vmem>>, %arg12: memref<128x128xbf16, #tpu.memory_space<vmem>>, %arg13: memref<1x128xf32, #tpu.memory_space<vmem>>, %arg14: memref<128x128xbf16, #tpu.memory_space<vmem>>, %arg15: memref<1x128xf32, #tpu.memory_space<vmem>>, %arg16: memref<8x128xf32, #tpu.memory_space<vmem>>, %arg17: memref<8x128xf32, #tpu.memory_space<vmem>>) attributes {dimension_semantics = [#tpu.dimension_semantics<parallel>], iteration_bounds = array<i64: 1>, scalar_prefetch = 0 : i64, scratch_operands = 0 : i64, tpu.core_type = #tpu.core_type<tc>, window_params = [{transform_indices = @transform_0, window_bounds = array<i64: 8, 32>}, {transform_indices = @transform_1, window_bounds = array<i64: 8, 48>}, {pipeline_mode = #tpu.pipeline_mode<synchronous>, transform_indices = @transform_2, window_bounds = array<i64: 32, 512>}, {pipeline_mode = #tpu.pipeline_mode<synchronous>, transform_indices = @transform_3, window_bounds = array<i64: 48, 512>}, {pipeline_mode = #tpu.pipeline_mode<synchronous>, transform_indices = @transform_4, window_bounds = array<i64: 1, 512>}, {pipeline_mode = #tpu.pipeline_mode<synchronous>, transform_indices = @transform_5, window_bounds = array<i64: 512, 128>}, {pipeline_mode = #tpu.pipeline_mode<synchronous>, transform_indices = @transform_6, window_bounds = array<i64: 1, 128>}, {pipeline_mode = #tpu.pipeline_mode<synchronous>, transform_indices = @transform_7, window_bounds = array<i64: 32, 128>}, {pipeline_mode = #tpu.pipeline_mode<synchronous>, transform_indices = @transform_8, window_bounds = array<i64: 1, 128>}, {pipeline_mode = #tpu.pipeline_mode<synchronous>, transform_indices = @transform_9, window_bounds = array<i64: 48, 128>}, {pipeline_mode = #tpu.pipeline_mode<synchronous>, transform_indices = @transform_10, window_bounds = array<i64: 1, 128>}, {pipeline_mode = #tpu.pipeline_mode<synchronous>, transform_indices = @transform_11, window_bounds = array<i64: 128, 128>}, {pipeline_mode = #tpu.pipeline_mode<synchronous>, transform_indices = @transform_12, window_bounds = array<i64: 1, 128>}, {pipeline_mode = #tpu.pipeline_mode<synchronous>, transform_indices = @transform_13, window_bounds = array<i64: 128, 128>}, {pipeline_mode = #tpu.pipeline_mode<synchronous>, transform_indices = @transform_14, window_bounds = array<i64: 1, 128>}, {transform_indices = @transform_15, window_bounds = array<i64: 8, 128>}, {transform_indices = @transform_16, window_bounds = array<i64: 8, 128>}]} {
    %c0 = arith.constant 0 : index
    %c0_0 = arith.constant 0 : index
    %0 = vector.load %arg1[%c0, %c0_0] : memref<8x32xbf16, #tpu.memory_space<vmem>>, vector<8x32xbf16>
    %c0_1 = arith.constant 0 : index
    %c0_2 = arith.constant 0 : index
    %1 = vector.load %arg2[%c0_1, %c0_2] : memref<8x48xbf16, #tpu.memory_space<vmem>>, vector<8x48xbf16>
    %c0_3 = arith.constant 0 : index
    %c0_4 = arith.constant 0 : index
    %2 = vector.load %arg3[%c0_3, %c0_4] : memref<32x512xbf16, #tpu.memory_space<vmem>>, vector<32x512xbf16>
    %cst = arith.constant dense<0.000000e+00> : vector<8x512xf32>
    %3 = tpu.matmul %0, %2, %cst {dimension_numbers = #tpu.dot_dimension_numbers<[1], [0], [0], [1], [0, 0, 1, 1], [], []>} : vector<8x32xbf16>, vector<32x512xbf16>, vector<8x512xf32> -> vector<8x512xf32>
    %c0_5 = arith.constant 0 : index
    %c0_6 = arith.constant 0 : index
    %4 = vector.load %arg4[%c0_5, %c0_6] : memref<48x512xbf16, #tpu.memory_space<vmem>>, vector<48x512xbf16>
    %cst_7 = arith.constant dense<0.000000e+00> : vector<8x512xf32>
    %5 = tpu.matmul %1, %4, %cst_7 {dimension_numbers = #tpu.dot_dimension_numbers<[1], [0], [0], [1], [0, 0, 1, 1], [], []>} : vector<8x48xbf16>, vector<48x512xbf16>, vector<8x512xf32> -> vector<8x512xf32>
    %6 = arith.addf %3, %5 : vector<8x512xf32>
    %c0_8 = arith.constant 0 : index
    %c0_9 = arith.constant 0 : index
    %7 = vector.load %arg5[%c0_8, %c0_9] : memref<1x512xf32, #tpu.memory_space<vmem>>, vector<1x512xf32>
    %8 = vector.broadcast %7 : vector<1x512xf32> to vector<8x512xf32>
    %9 = arith.addf %6, %8 : vector<8x512xf32>
    %cst_10 = arith.constant 0.000000e+00 : f32
    %10 = vector.broadcast %cst_10 : f32 to vector<8x512xf32>
    %11 = arith.maximumf %9, %10 : vector<8x512xf32>
    %12 = arith.truncf %11 : vector<8x512xf32> to vector<8x512xbf16>
    %c0_11 = arith.constant 0 : index
    %c0_12 = arith.constant 0 : index
    %13 = vector.load %arg6[%c0_11, %c0_12] : memref<512x128xbf16, #tpu.memory_space<vmem>>, vector<512x128xbf16>
    %cst_13 = arith.constant dense<0.000000e+00> : vector<8x128xf32>
    %14 = tpu.matmul %12, %13, %cst_13 {dimension_numbers = #tpu.dot_dimension_numbers<[1], [0], [0], [1], [0, 0, 1, 1], [], []>} : vector<8x512xbf16>, vector<512x128xbf16>, vector<8x128xf32> -> vector<8x128xf32>
    %c0_14 = arith.constant 0 : index
    %c0_15 = arith.constant 0 : index
    %15 = vector.load %arg7[%c0_14, %c0_15] : memref<1x128xf32, #tpu.memory_space<vmem>>, vector<1x128xf32>
    %16 = vector.broadcast %15 : vector<1x128xf32> to vector<8x128xf32>
    %17 = arith.addf %14, %16 : vector<8x128xf32>
    %18 = arith.negf %17 : vector<8x128xf32>
    %19 = math.exp %18 : vector<8x128xf32>
    %cst_16 = arith.constant 1.000000e+00 : f32
    %20 = vector.broadcast %cst_16 : f32 to vector<8x128xf32>
    %21 = arith.addf %20, %19 : vector<8x128xf32>
    %22 = arith.divf %20, %21 : vector<8x128xf32>
    %c0_17 = arith.constant 0 : index
    %c0_18 = arith.constant 0 : index
    %23 = vector.load %arg17[%c0_17, %c0_18] : memref<8x128xf32, #tpu.memory_space<vmem>>, vector<8x128xf32>
    tpu.vector_store %arg17[%c0_17, %c0_18], %22 {strides = array<i32>} : memref<8x128xf32, #tpu.memory_space<vmem>>, vector<8x128xf32>,
    %c0_19 = arith.constant 0 : index
    %c0_20 = arith.constant 0 : index
    %24 = vector.load %arg8[%c0_19, %c0_20] : memref<32x128xbf16, #tpu.memory_space<vmem>>, vector<32x128xbf16>
    %cst_21 = arith.constant dense<0.000000e+00> : vector<8x128xf32>
    %25 = tpu.matmul %0, %24, %cst_21 {dimension_numbers = #tpu.dot_dimension_numbers<[1], [0], [0], [1], [0, 0, 1, 1], [], []>} : vector<8x32xbf16>, vector<32x128xbf16>, vector<8x128xf32> -> vector<8x128xf32>
    %c0_22 = arith.constant 0 : index
    %c0_23 = arith.constant 0 : index
    %26 = vector.load %arg9[%c0_22, %c0_23] : memref<1x128xf32, #tpu.memory_space<vmem>>, vector<1x128xf32>
    %27 = vector.broadcast %26 : vector<1x128xf32> to vector<8x128xf32>
    %28 = arith.addf %25, %27 : vector<8x128xf32>
    %c0_24 = arith.constant 0 : index
    %c0_25 = arith.constant 0 : index
    %29 = vector.load %arg10[%c0_24, %c0_25] : memref<48x128xbf16, #tpu.memory_space<vmem>>, vector<48x128xbf16>
    %cst_26 = arith.constant dense<0.000000e+00> : vector<8x128xf32>
    %30 = tpu.matmul %1, %29, %cst_26 {dimension_numbers = #tpu.dot_dimension_numbers<[1], [0], [0], [1], [0, 0, 1, 1], [], []>} : vector<8x48xbf16>, vector<48x128xbf16>, vector<8x128xf32> -> vector<8x128xf32>
    %c0_27 = arith.constant 0 : index
    %c0_28 = arith.constant 0 : index
    %31 = vector.load %arg11[%c0_27, %c0_28] : memref<1x128xf32, #tpu.memory_space<vmem>>, vector<1x128xf32>
    %32 = vector.broadcast %31 : vector<1x128xf32> to vector<8x128xf32>
    %33 = arith.addf %30, %32 : vector<8x128xf32>
    %34 = arith.mulf %28, %28 : vector<8x128xf32>
    %cst_29 = arith.constant dense<0.000000e+00> : vector<8xf32>
    %35 = vector.multi_reduction <add>, %34, %cst_29 [1] : vector<8x128xf32> to vector<8xf32>
    %36 = vector.shape_cast %35 : vector<8xf32> to vector<8x1xf32>
    %cst_30 = arith.constant 1.000000e-24 : f32
    %37 = vector.broadcast %cst_30 : f32 to vector<8x1xf32>
    %38 = arith.maximumf %36, %37 : vector<8x1xf32>
    %39 = math.rsqrt %38 : vector<8x1xf32>
    %40 = arith.mulf %33, %33 : vector<8x128xf32>
    %cst_31 = arith.constant dense<0.000000e+00> : vector<8xf32>
    %41 = vector.multi_reduction <add>, %40, %cst_31 [1] : vector<8x128xf32> to vector<8xf32>
    %42 = vector.shape_cast %41 : vector<8xf32> to vector<8x1xf32>
    %cst_32 = arith.constant 1.000000e-24 : f32
    %43 = vector.broadcast %cst_32 : f32 to vector<8x1xf32>
    %44 = arith.maximumf %42, %43 : vector<8x1xf32>
    %45 = math.rsqrt %44 : vector<8x1xf32>
    %46 = vector.extract_strided_slice %22 {offsets = [0, 0], sizes = [8, 1], strides = [1, 1]} : vector<8x128xf32> to vector<8x1xf32>
    %47 = arith.mulf %46, %39 : vector<8x1xf32>
    %48 = vector.broadcast %47 : vector<8x1xf32> to vector<8x128xf32>
    %49 = arith.mulf %28, %48 : vector<8x128xf32>
    %50 = vector.extract_strided_slice %22 {offsets = [0, 1], sizes = [8, 1], strides = [1, 1]} : vector<8x128xf32> to vector<8x1xf32>
    %51 = arith.mulf %50, %45 : vector<8x1xf32>
    %52 = vector.broadcast %51 : vector<8x1xf32> to vector<8x128xf32>
    %53 = arith.mulf %33, %52 : vector<8x128xf32>
    %54 = arith.addf %49, %53 : vector<8x128xf32>
    %55 = arith.truncf %54 : vector<8x128xf32> to vector<8x128xbf16>
    %c0_33 = arith.constant 0 : index
    %c0_34 = arith.constant 0 : index
    %56 = vector.load %arg12[%c0_33, %c0_34] : memref<128x128xbf16, #tpu.memory_space<vmem>>, vector<128x128xbf16>
    %cst_35 = arith.constant dense<0.000000e+00> : vector<8x128xf32>
    %57 = tpu.matmul %55, %56, %cst_35 {dimension_numbers = #tpu.dot_dimension_numbers<[1], [0], [0], [1], [0, 0, 1, 1], [], []>} : vector<8x128xbf16>, vector<128x128xbf16>, vector<8x128xf32> -> vector<8x128xf32>
    %c0_36 = arith.constant 0 : index
    %c0_37 = arith.constant 0 : index
    %58 = vector.load %arg13[%c0_36, %c0_37] : memref<1x128xf32, #tpu.memory_space<vmem>>, vector<1x128xf32>
    %59 = vector.broadcast %58 : vector<1x128xf32> to vector<8x128xf32>
    %60 = arith.addf %57, %59 : vector<8x128xf32>
    %cst_38 = arith.constant 0.000000e+00 : f32
    %61 = vector.broadcast %cst_38 : f32 to vector<8x128xf32>
    %62 = arith.maximumf %60, %61 : vector<8x128xf32>
    %63 = arith.truncf %62 : vector<8x128xf32> to vector<8x128xbf16>
    %c0_39 = arith.constant 0 : index
    %c0_40 = arith.constant 0 : index
    %64 = vector.load %arg14[%c0_39, %c0_40] : memref<128x128xbf16, #tpu.memory_space<vmem>>, vector<128x128xbf16>
    %cst_41 = arith.constant dense<0.000000e+00> : vector<8x128xf32>
    %65 = tpu.matmul %63, %64, %cst_41 {dimension_numbers = #tpu.dot_dimension_numbers<[1], [0], [0], [1], [0, 0, 1, 1], [], []>} : vector<8x128xbf16>, vector<128x128xbf16>, vector<8x128xf32> -> vector<8x128xf32>
    %c0_42 = arith.constant 0 : index
    %c0_43 = arith.constant 0 : index
    %66 = vector.load %arg15[%c0_42, %c0_43] : memref<1x128xf32, #tpu.memory_space<vmem>>, vector<1x128xf32>
    %67 = vector.broadcast %66 : vector<1x128xf32> to vector<8x128xf32>
    %68 = arith.addf %65, %67 : vector<8x128xf32>
    %c0_44 = arith.constant 0 : index
    %c0_45 = arith.constant 0 : index
    %69 = vector.load %arg16[%c0_44, %c0_45] : memref<8x128xf32, #tpu.memory_space<vmem>>, vector<8x128xf32>
    tpu.vector_store %arg16[%c0_44, %c0_45], %68 {strides = array<i32>} : memref<8x128xf32, #tpu.memory_space<vmem>>, vector<8x128xf32>,
    return
  }
  func.func @transform_0(%arg0: i32) -> (i32, i32) {
    %c0_i32 = arith.constant 0 : i32
    %c0_i32_0 = arith.constant 0 : i32
    return %arg0, %c0_i32 : i32, i32
  }
  func.func @transform_1(%arg0: i32) -> (i32, i32) {
    %c0_i32 = arith.constant 0 : i32
    %c0_i32_0 = arith.constant 0 : i32
    return %arg0, %c0_i32 : i32, i32
  }
  func.func @transform_2(%arg0: i32) -> (i32, i32) {
    %c0_i32 = arith.constant 0 : i32
    %c0_i32_0 = arith.constant 0 : i32
    %c0_i32_1 = arith.constant 0 : i32
    return %c0_i32, %c0_i32_0 : i32, i32
  }
  func.func @transform_3(%arg0: i32) -> (i32, i32) {
    %c0_i32 = arith.constant 0 : i32
    %c0_i32_0 = arith.constant 0 : i32
    %c0_i32_1 = arith.constant 0 : i32
    return %c0_i32, %c0_i32_0 : i32, i32
  }
  func.func @transform_4(%arg0: i32) -> (i32, i32) {
    %c0_i32 = arith.constant 0 : i32
    %c0_i32_0 = arith.constant 0 : i32
    %c0_i32_1 = arith.constant 0 : i32
    return %c0_i32, %c0_i32_0 : i32, i32
  }
  func.func @transform_5(%arg0: i32) -> (i32, i32) {
    %c0_i32 = arith.constant 0 : i32
    %c0_i32_0 = arith.constant 0 : i32
    %c0_i32_1 = arith.constant 0 : i32
    return %c0_i32, %c0_i32_0 : i32, i32
  }
  func.func @transform_6(%arg0: i32) -> (i32, i32) {
    %c0_i32 = arith.constant 0 : i32
    %c0_i32_0 = arith.constant 0 : i32
    %c0_i32_1 = arith.constant 0 : i32
    return %c0_i32, %c0_i32_0 : i32, i32
  }
  func.func @transform_7(%arg0: i32) -> (i32, i32) {
    %c0_i32 = arith.constant 0 : i32
    %c0_i32_0 = arith.constant 0 : i32
    %c0_i32_1 = arith.constant 0 : i32
    return %c0_i32, %c0_i32_0 : i32, i32
  }
  func.func @transform_8(%arg0: i32) -> (i32, i32) {
    %c0_i32 = arith.constant 0 : i32
    %c0_i32_0 = arith.constant 0 : i32
    %c0_i32_1 = arith.constant 0 : i32
    return %c0_i32, %c0_i32_0 : i32, i32
  }
  func.func @transform_9(%arg0: i32) -> (i32, i32) {
    %c0_i32 = arith.constant 0 : i32
    %c0_i32_0 = arith.constant 0 : i32
    %c0_i32_1 = arith.constant 0 : i32
    return %c0_i32, %c0_i32_0 : i32, i32
  }
  func.func @transform_10(%arg0: i32) -> (i32, i32) {
    %c0_i32 = arith.constant 0 : i32
    %c0_i32_0 = arith.constant 0 : i32
    %c0_i32_1 = arith.constant 0 : i32
    return %c0_i32, %c0_i32_0 : i32, i32
  }
  func.func @transform_11(%arg0: i32) -> (i32, i32) {
    %c0_i32 = arith.constant 0 : i32
    %c0_i32_0 = arith.constant 0 : i32
    %c0_i32_1 = arith.constant 0 : i32
    return %c0_i32, %c0_i32_0 : i32, i32
  }
  func.func @transform_12(%arg0: i32) -> (i32, i32) {
    %c0_i32 = arith.constant 0 : i32
    %c0_i32_0 = arith.constant 0 : i32
    %c0_i32_1 = arith.constant 0 : i32
    return %c0_i32, %c0_i32_0 : i32, i32
  }
  func.func @transform_13(%arg0: i32) -> (i32, i32) {
    %c0_i32 = arith.constant 0 : i32
    %c0_i32_0 = arith.constant 0 : i32
    %c0_i32_1 = arith.constant 0 : i32
    return %c0_i32, %c0_i32_0 : i32, i32
  }
  func.func @transform_14(%arg0: i32) -> (i32, i32) {
    %c0_i32 = arith.constant 0 : i32
    %c0_i32_0 = arith.constant 0 : i32
    %c0_i32_1 = arith.constant 0 : i32
    return %c0_i32, %c0_i32_0 : i32, i32
  }
  func.func @transform_15(%arg0: i32) -> (i32, i32) {
    %c0_i32 = arith.constant 0 : i32
    %c0_i32_0 = arith.constant 0 : i32
    return %arg0, %c0_i32 : i32, i32
  }
  func.func @transform_16(%arg0: i32) -> (i32, i32) {
    %c0_i32 = arith.constant 0 : i32
    %c0_i32_0 = arith.constant 0 : i32
    return %arg0, %c0_i32 : i32, i32
  }
}

</mosaic_0001>

<bundles_post_ra>
// kernel: tpu_custom_call.1
= control target key start
LH: loop header
LB: loop body
LE: loop exit
PB: predicated region body
PF: predicated region fallthrough
CT: control target
= control target key end

     0   :  { %s2147_s0 = inlined_call_operand.hbm [shape: bf16[8,32], index: 0, kind: input, shape index: {}]   ;;  %s2148_s1 = inlined_call_operand.hbm [shape: bf16[8,48], index: 1, kind: input, shape index: {}]   ;;  %s2149_s2 = inlined_call_operand.hbm [shape: bf16[32,512], index: 2, kind: input, shape index: {}]   ;;  %s2150_s3 = inlined_call_operand.hbm [shape: bf16[48,512], index: 3, kind: input, shape index: {}]   ;;  %s2151_s4 = inlined_call_operand.vmem [shape: f32[1,512], index: 4, kind: input, shape index: {}]   ;;  %s2152_s5 = inlined_call_operand.hbm [shape: bf16[512,128], index: 5, kind: input, shape index: {}]   ;;  %s2153_s6 = inlined_call_operand.vmem [shape: f32[1,128], index: 6, kind: input, shape index: {}]   ;;  %s2154_s7 = inlined_call_operand.hbm [shape: bf16[32,128], index: 7, kind: input, shape index: {}]   ;;  %s2155_s8 = inlined_call_operand.vmem [shape: f32[1,128], index: 8, kind: input, shape index: {}]   ;;  %s2156_s9 = inlined_call_operand.vmem [shape: bf16[48,128], index: 9, kind: input, shape index: {}]   ;;  %s2157_s10 = inlined_call_operand.vmem [shape: f32[1,128], index: 10, kind: input, shape index: {}]   ;;  %s2158_s11 = inlined_call_operand.hbm [shape: bf16[128,128], index: 11, kind: input, shape index: {}]   ;;  %s2159_s12 = inlined_call_operand.vmem [shape: f32[1,128], index: 12, kind: input, shape index: {}]   ;;  %s2160_s13 = inlined_call_operand.hbm [shape: bf16[128,128], index: 13, kind: input, shape index: {}]   ;;  %s2161_s14 = inlined_call_operand.vmem [shape: f32[1,128], index: 14, kind: input, shape index: {}]   ;;  %s2162_s15 = inlined_call_operand.hbm [shape: f32[8,128], index: 15, kind: output, shape index: {0}]   ;;  %s2163_s16 = inlined_call_operand.hbm [shape: f32[8,128], index: 16, kind: output, shape index: {1}]  }
   0x1   :  { %2167 = sst [smem:[#allocation26_spill]] %s2147_s0 }
   0x2   :  { %22 = vsyncpa [#allocation3], 0 }
   0x3   :  { %23 = vsyncpa [#allocation6], 0 }
   0x4   :  { %24 = vsyncpa [#allocation9], 0 }
   0x5   :  { %25 = vsyncpa [#allocation12], 0 }
   0x6   :  { %26 = vsyncpa [#allocation15], 0 }
   0x7   :  { %27 = vsyncpa [#allocation4], 0 }
   0x8   :  { %28 = vsyncpa [#allocation18], 0  ;;  %s1814_s21 = smov [#allocation5]   ;;  %s1580_s25 = scalar_lea.hbm %s2148_s1, 64 }
   0x9   :  { %s45_s22 = sshll.u32 %s1814_s21, 4  ;;  %p1581_p0 = scmp.ne.s32.totalorder %s2148_s1, %s1580_s25  ;;  %s46_s22 = int_to_ptr.vmem [resolvable:$true] %s45_s22 }
   0xa   :  { %p1584_p1 = scmp.lt.u32.totalorder %s1580_s25, %s2148_s1 }
   0xc   :  { %p1586_p2 = pnand %p1584_p1, %p1581_p0 }
   0xe   :  { %1589 = shalt.err (!%p1586_p2)
}
   0xf   :  { %s1590_s30 = scalar_lea.vmem %s46_s22, 64  ;;  %p1595_p4 = scmp.lt.s32.totalorder %s46_s22, %s46_s22 }
  0x10   :  { %p1591_p3 = scmp.ne.s32.totalorder %s46_s22, %s1590_s30  ;;  %p1596_p5 = scmp.lt.s32.totalorder %s1590_s30, %s1590_s30 }
  0x12   :  { %p1597_p6 = por %p1596_p5, %p1595_p4 }
  0x14   :  { %p1598_p7 = pnand %p1597_p6, %p1591_p3 }
  0x16   :  { %1601 = shalt.err (!%p1598_p7)
}
  0x17   :  { %48 = dma.hbm_to_vmem [thread:$0]  %s2148_s1, 64, %s46_s22, [#allocation6]  }
  0x18   :  { %s1815_s18 = smov [#allocation8]   ;;  %s1602_s23 = scalar_lea.hbm %s2150_s3, 1536 }
  0x19   :  { %s66_s19 = sshll.u32 %s1815_s18, 4  ;;  %p1603_p8 = scmp.ne.s32.totalorder %s2150_s3, %s1602_s23  ;;  %s67_s19 = int_to_ptr.vmem [resolvable:$true] %s66_s19 }
  0x1a   :  { %p1606_p9 = scmp.lt.u32.totalorder %s1602_s23, %s2150_s3 }
  0x1c   :  { %p1608_p10 = pnand %p1606_p9, %p1603_p8 }
  0x1e   :  { %1611 = shalt.err (!%p1608_p10)
}
  0x1f   :  { %s1612_s28 = scalar_lea.vmem %s67_s19, 1536  ;;  %p1617_p12 = scmp.lt.s32.totalorder %s67_s19, %s67_s19 }
  0x20   :  { %p1613_p11 = scmp.ne.s32.totalorder %s67_s19, %s1612_s28  ;;  %p1618_p13 = scmp.lt.s32.totalorder %s1612_s28, %s1612_s28 }
  0x22   :  { %p1619_p0 = por %p1618_p13, %p1617_p12 }
  0x24   :  { %p1620_p1 = pnand %p1619_p0, %p1613_p11 }
  0x26   :  { %1623 = shalt.err (!%p1620_p1)
}
  0x27   :  { %s1816_s1 = smov 256   ;;  %s1817_s22 = smov 16  }
  0x28   :  { %72 = dma.hbm_to_vmem [thread:$0]  %s2150_s3, 1536, %s67_s19, [#allocation9], %s1816_s1, %s1816_s1, %s1817_s22  }
  0x29   :  { %s1818_s0 = smov [#allocation11]   ;;  %s1819_s18 = smov [#allocation2]  }
  0x2a   :  { %s94_s17 = sshll.u32 %s1818_s0, 4  ;;  %s35_s20 = sshll.u32 %s1819_s18, 4  ;;  %s95_s17 = int_to_ptr.vmem [resolvable:$true] %s94_s17  ;;  %s36_s20 = int_to_ptr.vmem [resolvable:$true] %s35_s20 }
  0x2b   :  { %s1624_s24 = scalar_lea.hbm %s2154_s7, 256 }
  0x2c   :  { %p1625_p2 = scmp.ne.s32.totalorder %s2154_s7, %s1624_s24  ;;  %p1628_p3 = scmp.lt.u32.totalorder %s1624_s24, %s2154_s7 }
  0x2e   :  { %p1630_p4 = pnand %p1628_p3, %p1625_p2 }
  0x30   :  { %1633 = shalt.err (!%p1630_p4)
}
  0x31   :  { %s1634_s3 = scalar_lea.vmem %s95_s17, 256  ;;  %p1639_p6 = scmp.lt.s32.totalorder %s95_s17, %s95_s17 }
  0x32   :  { %p1635_p5 = scmp.ne.s32.totalorder %s95_s17, %s1634_s3  ;;  %p1640_p7 = scmp.lt.s32.totalorder %s1634_s3, %s1634_s3 }
  0x34   :  { %p1641_p8 = por %p1640_p7, %p1639_p6 }
  0x36   :  { %p1642_p9 = pnand %p1641_p8, %p1635_p5 }
  0x38   :  { %1645 = shalt.err (!%p1642_p9)
}
  0x39   :  { %s2165_s19 = smov 64   ;;  %s1821_s29 = smov 4  }
  0x3a   :  { %100 = dma.hbm_to_vmem [thread:$0]  %s2154_s7, 256, %s95_s17, [#allocation12], %s2165_s19, %s2165_s19, %s1821_s29  }
  0x3b   :  { %s2168_s23 = sld [smem:[#allocation26_spill]] }
  0x41   :  { %s1646_s24 = scalar_lea.hbm %s2168_s23, 64 }
  0x42   :  { %p1647_p10 = scmp.ne.s32.totalorder %s2168_s23, %s1646_s24  ;;  %p1650_p11 = scmp.lt.u32.totalorder %s1646_s24, %s2168_s23 }
  0x44   :  { %p1652_p12 = pnand %p1650_p11, %p1647_p10 }
  0x46   :  { %1655 = shalt.err (!%p1652_p12)
}
  0x47   :  { %s1656_s3 = scalar_lea.vmem %s36_s20, 64  ;;  %p1661_p0 = scmp.lt.s32.totalorder %s36_s20, %s36_s20 }
  0x48   :  { %p1657_p13 = scmp.ne.s32.totalorder %s36_s20, %s1656_s3  ;;  %p1662_p1 = scmp.lt.s32.totalorder %s1656_s3, %s1656_s3 }
  0x4a   :  { %p1663_p2 = por %p1662_p1, %p1661_p0 }
  0x4c   :  { %p1664_p3 = pnand %p1663_p2, %p1657_p13 }
  0x4e   :  { %1667 = shalt.err (!%p1664_p3)
}
  0x4f   :  { %38 = dma.hbm_to_vmem [thread:$0]  %s2168_s23, 64, %s36_s20, [#allocation3]  }
  0x50   :  { %s1822_s30 = smov [#allocation7]   ;;  %s1823_s18 = smov [#allocation10]  }
  0x51   :  { %s54_s0 = sshll.u32 %s1822_s30, 4  ;;  %s80_s21 = sshll.u32 %s1823_s18, 4  ;;  %s55_s0 = int_to_ptr.vmem [resolvable:$true] %s54_s0  ;;  %s1971_s21 = int_to_ptr.vmem [resolvable:$true] %s80_s21 }
  0x52   :  { %s1668_s26 = scalar_lea.hbm %s2149_s2, 1024 }
  0x53   :  { %p1669_p4 = scmp.ne.s32.totalorder %s2149_s2, %s1668_s26  ;;  %p1672_p5 = scmp.lt.u32.totalorder %s1668_s26, %s2149_s2 }
  0x55   :  { %p1674_p6 = pnand %p1672_p5, %p1669_p4 }
  0x57   :  { %1677 = shalt.err (!%p1674_p6)
}
  0x58   :  { %s1678_s20 = scalar_lea.vmem %s55_s0, 1024  ;;  %p1683_p8 = scmp.lt.s32.totalorder %s55_s0, %s55_s0 }
  0x59   :  { %p1679_p7 = scmp.ne.s32.totalorder %s55_s0, %s1678_s20  ;;  %p1684_p9 = scmp.lt.s32.totalorder %s1678_s20, %s1678_s20 }
  0x5b   :  { %p1685_p10 = por %p1684_p9, %p1683_p8 }
  0x5d   :  { %p1686_p11 = pnand %p1685_p10, %p1679_p7 }
  0x5f   :  { %1689 = shalt.err (!%p1686_p11)
}
  0x60   :  { %60 = dma.hbm_to_vmem [thread:$0]  %s2149_s2, 1024, %s55_s0, [#allocation6], %s1816_s1, %s1816_s1, %s1817_s22  }
  0x61   :  { %s1690_s19 = scalar_lea.hbm %s2152_s5, 4096 }
  0x62   :  { %p1691_p12 = scmp.ne.s32.totalorder %s2152_s5, %s1690_s19  ;;  %p1694_p13 = scmp.lt.u32.totalorder %s1690_s19, %s2152_s5 }
  0x64   :  { %p1696_p0 = pnand %p1694_p13, %p1691_p12 }
  0x66   :  { %1699 = shalt.err (!%p1696_p0)
}
  0x67   :  { %s1700_s27 = scalar_lea.vmem %s1971_s21, 4096  ;;  %p1705_p2 = scmp.lt.s32.totalorder %s1971_s21, %s1971_s21 }
  0x68   :  { %p1701_p1 = scmp.ne.s32.totalorder %s1971_s21, %s1700_s27  ;;  %p1706_p3 = scmp.lt.s32.totalorder %s1700_s27, %s1700_s27 }
  0x6a   :  { %p1707_p4 = por %p1706_p3, %p1705_p2 }
  0x6c   :  { %p1708_p5 = pnand %p1707_p4, %p1701_p1 }
  0x6e   :  { %1711 = shalt.err (!%p1708_p5)
}
  0x6f   :  { %s2169_s2 = smov 64   ;;  %s1824_s0 = smov [#allocation13]  }
  0x70   :  { %86 = dma.hbm_to_vmem [thread:$0]  %s2152_s5, 4096, %s1971_s21, [#allocation9], %s2169_s2, %s2169_s2, %s1821_s29  }
  0x71   :  { %s112_s28 = sshll.u32 %s1824_s0, 4  ;;  %s1825_s3 = smov [#allocation14]   ;;  %s113_s28 = int_to_ptr.vmem [resolvable:$true] %s112_s28 }
  0x72   :  { %s126_s20 = sshll.u32 %s1825_s3, 4  ;;  %s1712_s17 = scalar_lea.hbm %s2158_s11, 1024  ;;  %s2008_s20 = int_to_ptr.vmem [resolvable:$true] %s126_s20 }
  0x73   :  { %p1713_p6 = scmp.ne.s32.totalorder %s2158_s11, %s1712_s17  ;;  %p1716_p7 = scmp.lt.u32.totalorder %s1712_s17, %s2158_s11 }
  0x75   :  { %p1718_p8 = pnand %p1716_p7, %p1713_p6 }
  0x77   :  { %1721 = shalt.err (!%p1718_p8)
}
  0x78   :  { %s1722_s5 = scalar_lea.vmem %s113_s28, 1024  ;;  %p1727_p10 = scmp.lt.s32.totalorder %s113_s28, %s113_s28 }
  0x79   :  { %p1723_p9 = scmp.ne.s32.totalorder %s113_s28, %s1722_s5  ;;  %p1728_p11 = scmp.lt.s32.totalorder %s1722_s5, %s1722_s5 }
  0x7b   :  { %p1729_p12 = por %p1728_p11, %p1727_p10 }
  0x7d   :  { %p1730_p13 = pnand %p1729_p12, %p1723_p9 }
  0x7f   :  { %1733 = shalt.err (!%p1730_p13)
}
  0x80   :  { %118 = dma.hbm_to_vmem [thread:$0]  %s2158_s11, 1024, %s113_s28, [#allocation12], %s2169_s2, %s2169_s2, %s1821_s29  }
  0x81   :  { %s1734_s1 = scalar_lea.hbm %s2160_s13, 1024 }
  0x82   :  { %p1735_p0 = scmp.ne.s32.totalorder %s2160_s13, %s1734_s1  ;;  %p1738_p1 = scmp.lt.u32.totalorder %s1734_s1, %s2160_s13 }
  0x84   :  { %p1740_p2 = pnand %p1738_p1, %p1735_p0 }
  0x86   :  { %1743 = shalt.err (!%p1740_p2)
}
  0x87   :  { %s1744_s7 = scalar_lea.vmem %s2008_s20, 1024  ;;  %p1749_p4 = scmp.lt.s32.totalorder %s2008_s20, %s2008_s20 }
  0x88   :  { %p1745_p3 = scmp.ne.s32.totalorder %s2008_s20, %s1744_s7  ;;  %p1750_p5 = scmp.lt.s32.totalorder %s1744_s7, %s1744_s7 }
  0x8a   :  { %p1751_p6 = por %p1750_p5, %p1749_p4 }
  0x8c   :  { %p1752_p7 = pnand %p1751_p6, %p1745_p3 }
  0x8e   :  { %1755 = shalt.err (!%p1752_p7)
}
  0x8f   :  { %132 = dma.hbm_to_vmem [thread:$0]  %s2160_s13, 1024, %s2008_s20, [#allocation15], %s2169_s2, %s2169_s2, %s1821_s29  }
  0x90   :  { %1800 = dma.done.wait [#allocation3], 64  }
  0x91   :  { %1801 = vsyncadd [#allocation3], 4294967232 }
  0x92   :  { %1802 = dma.done.wait [#allocation6], 1088  }
  0x93   :  { %1803 = vsyncadd [#allocation6], 4294966208 }
  0x94   :  { %1804 = dma.done.wait [#allocation9], 5632  }
  0x95   :  { %1805 = vsyncadd [#allocation9], 4294961664 }
  0x96   :  { %1806 = dma.done.wait [#allocation12], 1280  }
  0x97   :  { %1807 = vsyncadd [#allocation12], 4294966016 }
  0x98   :  { %1808 = dma.done.wait [#allocation15], 1024  }
  0x99   :  { %1809 = vsyncadd [#allocation15], 4294966272  ;;  %v1826_v0 = vmov 0   ;;  %v1489_v1 = vld [vmem:[#allocation8 + $0x4] ss:$16 sps:$4 sm:$0xff]   ;;  %vm242_vm0 = vcmask 392192   ;;  %v456_v56 = vlaneseq }
  0x9a   :  { %278 = vmatprep.mubr.bf16.mxu0 %v1826_v0  ;;  %319 = vmatprep.mubr.bf16.mxu1 %v1826_v0  ;;  %v1491_v2 = vld [vmem:[#allocation8 + $0xc] ss:$16 sps:$4 sm:$0xff]   ;;  %v1493_v3 = vld [vmem:[#allocation8] ss:$16 sps:$4 sm:$0xff]   ;;  %v1494_v4 = vld [vmem:[#allocation8 + $0x8] ss:$16 sps:$4 sm:$0xff]  }
  0x9b   :  { %1486 = vset.pattern.permute.xlu1 %v1826_v0  ;;  %246 = vmatprep.subr.bf16.mxu0 %v1489_v1  ;;  %v1495_v5 = vld [vmem:[#allocation8 + $0x24] ss:$16 sps:$4 sm:$0xff]   ;;  %v1497_v6 = vld [vmem:[#allocation8 + $0x2c] ss:$16 sps:$4 sm:$0xff]   ;;  %v1499_v7 = vld [vmem:[#allocation8 + $0x20] ss:$16 sps:$4 sm:$0xff]  }
  0x9c   :  { %287 = vmatprep.subr.bf16.mxu1 %v1491_v2  ;;  %247 = vmatpush1.bf16.msra.mxu0 %v1493_v3  ;;  %v1500_v8 = vld [vmem:[#allocation8 + $0x28] ss:$16 sps:$4 sm:$0xff]   ;;  %v1501_v9 = vld [vmem:[#allocation8 + $0x44] ss:$16 sps:$4 sm:$0xff]   ;;  %v1503_v10 = vld [vmem:[#allocation8 + $0x4c] ss:$16 sps:$4 sm:$0xff]  }
  0x9d   :  { %288 = vmatpush1.bf16.msra.mxu1 %v1494_v4  ;;  %248 = vmatprep.subr.bf16.mxu0 %v1495_v5  ;;  %v1505_v11 = vld [vmem:[#allocation8 + $0x40] ss:$16 sps:$4 sm:$0xff]   ;;  %v1506_v12 = vld [vmem:[#allocation8 + $0x48] ss:$16 sps:$4 sm:$0xff]   ;;  %v1509_v13 = vld [vmem:[#allocation7 + $0x4] ss:$16 sps:$4 sm:$0xff]  }
  0x9e   :  { %289 = vmatprep.subr.bf16.mxu1 %v1497_v6  ;;  %v2045_v14 = vld [vmem:[#allocation5] sm:$0xf]  ;;  %v1507_v16 = vld [vmem:[#allocation7] ss:$16 sps:$4 sm:$0xff]   ;;  %v1510_v17 = vld [vmem:[#allocation7 + $0x8] ss:$16 sps:$4 sm:$0xff]  }
  0x9f   :  { %v1512_v15 = vld [vmem:[#allocation7 + $0xc] ss:$16 sps:$4 sm:$0xff]   ;;  %v1515_v18 = vld [vmem:[#allocation7 + $0x24] ss:$16 sps:$4 sm:$0xff]   ;;  %v1513_v20 = vld [vmem:[#allocation7 + $0x20] ss:$16 sps:$4 sm:$0xff]  }
  0xa0   :  { %249 = vmatpush1.bf16.msra.mxu0 %v1499_v7  ;;  %v1518_v19 = vld [vmem:[#allocation7 + $0x2c] ss:$16 sps:$4 sm:$0xff]   ;;  %v1516_v21 = vld [vmem:[#allocation7 + $0x28] ss:$16 sps:$4 sm:$0xff]   ;;  %v1519_v22 = vld [vmem:[#allocation10 + $0xc0] sm:$0xff]   ;;  %vm368_vm1 = vcmask 261120  }
  0xa1   :  { %290 = vmatpush1.bf16.msra.mxu1 %v1500_v8  ;;  %250 = vmatprep.subr.bf16.mxu0 %v1501_v9  ;;  %v1520_v23 = vld [vmem:[#allocation10 + $0x40] sm:$0xff]   ;;  %v2051_v24 = vld [vmem:[#allocation2] sm:$0xf]  ;;  %v1523_v27 = vld [vmem:[#allocation10 + $0xc8] sm:$0xff]   ;;  %v1827_v55 = vmov 0.0   ;;  %v457_v57 = vshrl.u32 %v456_v56, 7 }
  0xa2   :  { %291 = vmatprep.subr.bf16.mxu1 %v1503_v10  ;;  %v1521_v25 = vld [vmem:[#allocation10 + $0x80] sm:$0xff]   ;;  %v1524_v28 = vld [vmem:[#allocation10 + $0x48] sm:$0xff]   ;;  %v1527_v31 = vld [vmem:[#allocation10 + $0xd0] sm:$0xff]   ;;  %vm1828_vm2 = vmmov 0   ;;  %s1830_s25 = smov [#allocation17]  }
  0xa3   :  { %v1522_v26 = vld [vmem:[#allocation10] sm:$0xff]   ;;  %v1525_v29 = vld [vmem:[#allocation10 + $0x88] sm:$0xff]   ;;  %v1528_v32 = vld [vmem:[#allocation10 + $0x50] sm:$0xff]   ;;  %v458_v2 = vsub.s32 0, %v457_v57  ;;  %v466_v3 = vsub.s32 2, %v457_v57  ;;  %v462_v5 = vsub.s32 1, %v457_v57 }
  0xa4   :  { %251 = vmatpush1.bf16.msra.mxu0 %v1505_v11  ;;  %v1526_v30 = vld [vmem:[#allocation10 + $0x8] sm:$0xff]   ;;  %v1529_v33 = vld [vmem:[#allocation10 + $0x90] sm:$0xff]   ;;  %v1531_v35 = vld [vmem:[#allocation10 + $0xd8] sm:$0xff]   ;;  %v470_v6 = vsub.s32 3, %v457_v57  ;;  %s1239_s26 = sshll.u32 %s1830_s25, 4  ;;  %s1240_s26 = int_to_ptr.vmem [resolvable:$true] %s1239_s26 }
  0xa5   :  { %292 = vmatpush1.bf16.msra.mxu1 %v1506_v12  ;;  %372 = vmatprep.subr.bf16.mxu0 %v1509_v13  ;;  %v1530_v34 = vld [vmem:[#allocation10 + $0x10] sm:$0xff]   ;;  %v1532_v36 = vld [vmem:[#allocation10 + $0x58] sm:$0xff]   ;;  %v1535_v39 = vld [vmem:[#allocation10 + $0xe0] sm:$0xff]   ;;  %s1756_s27 = scalar_lea.vmem %s1240_s26, 128  ;;  %p1761_p9 = scmp.lt.s32.totalorder %s1240_s26, %s1240_s26 }
  0xa6   :  { %413 = vmatprep.subr.bf16.mxu1 %v1512_v15  ;;  %v1533_v37 = vld [vmem:[#allocation10 + $0x98] sm:$0xff]   ;;  %v1536_v40 = vld [vmem:[#allocation10 + $0x60] sm:$0xff]   ;;  %v1539_v43 = vld [vmem:[#allocation10 + $0xe8] sm:$0xff]   ;;  %p1757_p8 = scmp.ne.s32.totalorder %s1240_s26, %s1756_s27  ;;  %p1762_p10 = scmp.lt.s32.totalorder %s1756_s27, %s1756_s27 }
  0xa7   :  { %1268 = vmatmul.mubr.msk.bf16.vlgmr.msra.gmra.mrb[0].mxu0 %vm242_vm0, %v2045_v14  ;;  %v1534_v38 = vld [vmem:[#allocation10 + $0x18] sm:$0xff]   ;;  %v1537_v41 = vld [vmem:[#allocation10 + $0xa0] sm:$0xff]   ;;  %v1540_v44 = vld [vmem:[#allocation10 + $0x68] sm:$0xff]  }
  0xa8   :  { %1269 = vmatmul.mubr.msk.bf16.vlgmr.msra.gmra.mrb[0].mxu1 %vm242_vm0, %v2045_v14  ;;  %373 = vmatpush1.bf16.msra.mxu0 %v1507_v16  ;;  %v1538_v42 = vld [vmem:[#allocation10 + $0x20] sm:$0xff]   ;;  %v1541_v45 = vld [vmem:[#allocation10 + $0xa8] sm:$0xff]   ;;  %v1543_v47 = vld [vmem:[#allocation10 + $0xf0] sm:$0xff]   ;;  %p1763_p11 = por %p1762_p10, %p1761_p9 }
  0xa9   :  { %414 = vmatpush1.bf16.msra.mxu1 %v1510_v17  ;;  %374 = vmatprep.subr.bf16.mxu0 %v1515_v18  ;;  %v1542_v46 = vld [vmem:[#allocation10 + $0x28] sm:$0xff]   ;;  %v1544_v48 = vld [vmem:[#allocation10 + $0x70] sm:$0xff]   ;;  %v1547_v51 = vld [vmem:[#allocation10 + $0xf8] sm:$0xff]  }
  0xaa   :  { %415 = vmatprep.subr.bf16.mxu1 %v1518_v19  ;;  %404 = vmatprep.mubr.bf16.mxu0 %v1826_v0  ;;  %v1545_v49 = vld [vmem:[#allocation10 + $0xb0] sm:$0xff]   ;;  %v1548_v52 = vld [vmem:[#allocation10 + $0x78] sm:$0xff]   ;;  %v454_v4 = vld [vmem:[%s2151_s4] sm:$0xf]  ;;  %p1764_p12 = pnand %p1763_p11, %p1757_p8 }
  0xab   :  { %445 = vmatprep.mubr.bf16.mxu1 %v1826_v0  ;;  %v1546_v50 = vld [vmem:[#allocation10 + $0x30] sm:$0xff]   ;;  %v1549_v53 = vld [vmem:[#allocation10 + $0xb8] sm:$0xff]   ;;  %v459_v7 = vrot.slane %v454_v4, %v458_v2  ;;  %v467_v8 = vrot.slane %v454_v4, %v466_v3  ;;  %v463_v11 = vrot.slane %v454_v4, %v462_v5  ;;  %v471_v12 = vrot.slane %v454_v4, %v470_v6 }
  0xac   :  { %375 = vmatpush1.bf16.msra.mxu0 %v1513_v20  ;;  %v1550_v54 = vld [vmem:[#allocation10 + $0x38] sm:$0xff]  }
  0xad   :  { %416 = vmatpush1.bf16.msra.mxu1 %v1516_v21  ;;  %1341 = vmatprep.subr.bf16.mxu0 %v1520_v23 }
  0xae   :  { %1363 = vmatprep.subr.bf16.mxu1 %v1519_v22 }
  0xaf   :  { %1278 = vmatmul.mubr.msk.bf16.vlgmr.msra.gmra.mrb[4].mxu0 %vm368_vm1, %v2051_v24 }
  0xb0   :  { %1279 = vmatmul.mubr.msk.bf16.vlgmr.msra.gmra.mrb[4].mxu1 %vm368_vm1, %v2051_v24  ;;  %1342 = vmatpush3.bf16.msra.mxu0 %v1522_v26 }
  0xb1   :  { %1364 = vmatpush3.bf16.msra.mxu1 %v1521_v25  ;;  %1343 = vmatprep.subr.bf16.mxu0 %v1524_v28 }
  0xb2   :  { %1365 = vmatprep.subr.bf16.mxu1 %v1523_v27 }
  0xb4   :  { %1344 = vmatpush3.bf16.msra.mxu0 %v1526_v30 }
  0xb5   :  { %1366 = vmatpush3.bf16.msra.mxu1 %v1525_v29  ;;  %1345 = vmatprep.subr.bf16.mxu0 %v1528_v32 }
  0xb6   :  { %1367 = vmatprep.subr.bf16.mxu1 %v1527_v31 }
  0xb8   :  { %1346 = vmatpush3.bf16.msra.mxu0 %v1530_v34 }
  0xb9   :  { %1368 = vmatpush3.bf16.msra.mxu1 %v1529_v33  ;;  %1347 = vmatprep.subr.bf16.mxu0 %v1532_v36  ;;  %v1552_v36 = vld [vmem:[#allocation11] sm:$0xff]  }
  0xba   :  { %1369 = vmatprep.subr.bf16.mxu1 %v1531_v35  ;;  %v1551_v35 = vld [vmem:[%s2156_s9] sm:$0xff]  }
  0xbc   :  { %1348 = vmatpush3.bf16.msra.mxu0 %v1534_v38 }
  0xbd   :  { %1370 = vmatpush3.bf16.msra.mxu1 %v1533_v37  ;;  %1349 = vmatprep.subr.bf16.mxu0 %v1536_v40  ;;  %v1554_v40 = vld [vmem:[#allocation11 + $0x8] sm:$0xff]  }
  0xbe   :  { %1371 = vmatprep.subr.bf16.mxu1 %v1535_v39  ;;  %v1553_v39 = vld [vmem:[%s2156_s9 + $0x8] sm:$0xff]  }
  0xc0   :  { %1350 = vmatpush3.bf16.msra.mxu0 %v1538_v42 }
  0xc1   :  { %1372 = vmatpush3.bf16.msra.mxu1 %v1537_v41  ;;  %1351 = vmatprep.subr.bf16.mxu0 %v1540_v44  ;;  %v1555_v41 = vld [vmem:[%s2156_s9 + $0x10] sm:$0xff]   ;;  %v1280_v44 = vld [vmem:[%s2153_s6] ss:$0 sm:$0xff] }
  0xc2   :  { %1373 = vmatprep.subr.bf16.mxu1 %v1539_v43 }
  0xc4   :  { %1352 = vmatpush3.bf16.msra.mxu0 %v1542_v46 }
  0xc5   :  { %1374 = vmatpush3.bf16.msra.mxu1 %v1541_v45  ;;  %1353 = vmatprep.subr.bf16.mxu0 %v1544_v48 }
  0xc6   :  { %1375 = vmatprep.subr.bf16.mxu1 %v1543_v47 }
  0xc8   :  { %1354 = vmatpush3.bf16.msra.mxu0 %v1546_v50 }
  0xc9   :  { %1376 = vmatpush3.bf16.msra.mxu1 %v1545_v49  ;;  %1355 = vmatprep.subr.bf16.mxu0 %v1548_v52 }
  0xca   :  { %1377 = vmatprep.subr.bf16.mxu1 %v1547_v51 }
  0xcc   :  { %1356 = vmatpush3.bf16.msra.mxu0 %v1550_v54 }
  0xcd   :  { %1378 = vmatpush3.bf16.msra.mxu1 %v1549_v53  ;;  %1410 = vmatprep.subr.bf16.mxu0 %v1827_v55 }
  0xce   :  { %1418 = vmatprep.subr.bf16.mxu1 %v1827_v55 }
 0x17a   :  { %v280_v58 = vpop.f32.mrb[0].mxu0 }
 0x17b   :  { %v321_v59 = vpop.f32.mrb[0].mxu1  ;;  %v282_v60 = vpop.f32.mrb[1].mxu0 }
 0x17c   :  { %v323_v61 = vpop.f32.mrb[1].mxu1  ;;  %v284_v62 = vpop.f32.mrb[2].mxu0 }
 0x17d   :  { %v325_v63 = vpop.f32.mrb[2].mxu1  ;;  %v285_v0 = vpop.f32.mrb[3].mxu0 }
 0x17e   :  { %v326_v1 = vpop.f32.mrb[3].mxu1 }
 0x182   :  { %v406_v9 = vpop.f32.mrb[4].mxu0 }
 0x183   :  { %v447_v10 = vpop.f32.mrb[4].mxu1  ;;  %v407_v13 = vadd.f32 %v406_v9, %v280_v58  ;;  %v408_v16 = vpop.f32.mrb[5].mxu0  ;;  %v1556_v9 = vld [vmem:[#allocation13] sm:$0xff]  }
 0x184   :  { %v448_v15 = vadd.f32 %v447_v10, %v321_v59  ;;  %v449_v17 = vpop.f32.mrb[5].mxu1  ;;  %v409_v18 = vadd.f32 %v408_v16, %v282_v60  ;;  %v410_v20 = vpop.f32.mrb[6].mxu0  ;;  %v1318_v60 = vld [vmem:[%s2157_s10] ss:$0 sm:$0xff]  ;;  %v1557_v10 = vld [vmem:[#allocation13 + $0x8] sm:$0xff]  }
 0x185   :  { %v450_v19 = vadd.f32 %v449_v17, %v323_v61  ;;  %v451_v21 = vpop.f32.mrb[6].mxu1  ;;  %v476_v22 = vadd.f32 %v459_v7, %v407_v13  ;;  %v411_v25 = vpop.f32.mrb[7].mxu0  ;;  %v1560_v13 = vld [vmem:[#allocation13 + $0x20] sm:$0xff]  }
 0x186   :  { %v478_v23 = vadd.f32 %v467_v8, %v448_v15  ;;  %v452_v26 = vpop.f32.mrb[7].mxu1  ;;  %v477_v27 = vadd.f32 %v463_v11, %v409_v18  ;;  %v1829_v8 = vmov 1   ;;  %v1558_v11 = vld [vmem:[#allocation13 + $0x10] sm:$0xff]   ;;  %v1561_v21 = vld [vmem:[#allocation13 + $0x28] sm:$0xff]  }
 0x187   :  { %v479_v28 = vadd.f32 %v471_v12, %v450_v19  ;;  %v480_v29 = vmax.f32 %v476_v22, 0.0  ;;  %1488 = vset.pattern.permute.xlu0 %v1829_v8  ;;  %v1559_v12 = vld [vmem:[#allocation13 + $0x18] sm:$0xff]  }
 0x188   :  { %v482_v30 = vmax.f32 %v478_v23, 0.0  ;;  %v481_v31 = vmax.f32 %v477_v27, 0.0  ;;  %v1562_v23 = vld [vmem:[#allocation13 + $0x30] sm:$0xff]   ;;  %v1563_v26 = vld [vmem:[#allocation13 + $0x38] sm:$0xff]   ;;  %v1564_v27 = vld [vmem:[#allocation14] sm:$0xff]  }
 0x189   :  { %v483_v32 = vmax.f32 %v479_v28, 0.0  ;;  %v484_v37 = vpack.c.bf16 %v480_v29, %v480_v29  ;;  %v1565_v28 = vld [vmem:[#allocation14 + $0x8] sm:$0xff]   ;;  %v1566_v29 = vld [vmem:[#allocation14 + $0x10] sm:$0xff]  }
 0x18a   :  { %v485_v33 = vpack.c.bf16 %v481_v31, %v481_v31  ;;  %v486_v38 = vpack.c.bf16 %v482_v30, %v482_v30  ;;  %v1567_v30 = vld [vmem:[#allocation14 + $0x18] sm:$0xff]   ;;  %v1568_v31 = vld [vmem:[#allocation14 + $0x20] sm:$0xff]  }
 0x18b   :  { %v487_v34 = vpack.c.bf16 %v483_v32, %v483_v32  ;;  %v1569_v32 = vld [vmem:[#allocation14 + $0x28] sm:$0xff]  }
 0x18c   :  { %783 = vmatprep.mubr.bf16.mxu0 %v485_v33 }
 0x18d   :  { %823 = vmatprep.mubr.bf16.mxu1 %v487_v34  ;;  %784 = vmatmul.mubr.bf16.vlgmr.msra.gmra.mrb[8].mxu0 %v484_v37 }
 0x18e   :  { %824 = vmatmul.mubr.bf16.vlgmr.msra.gmra.mrb[8].mxu1 %v486_v38  ;;  %1411 = vmatpush3.bf16.msra.mxu0 %v1552_v36 }
 0x18f   :  { %1419 = vmatpush3.bf16.msra.mxu1 %v1551_v35  ;;  %1412 = vmatprep.subr.bf16.mxu0 %v1827_v55 }
 0x190   :  { %1420 = vmatprep.subr.bf16.mxu1 %v1827_v55  ;;  %1414 = vmatprep.mubr.msk.bf16.mxu0 %vm1828_vm2, %v1827_v55 }
 0x191   :  { %1424 = vmatprep.mubr.msk.bf16.mxu1 %vm1828_vm2, %v1827_v55 }
 0x192   :  { %1413 = vmatpush3.bf16.msra.mxu0 %v1554_v40  ;;  %v1571_v40 = vld [vmem:[#allocation14 + $0x38] sm:$0xff]  }
 0x193   :  { %1421 = vmatpush3.bf16.msra.mxu1 %v1553_v39  ;;  %1428 = vmatprep.subr.bf16.mxu0 %v1827_v55  ;;  %v1570_v39 = vld [vmem:[#allocation14 + $0x30] sm:$0xff]  }
 0x194   :  { %1422 = vmatprep.subr.bf16.mxu1 %v1827_v55 }
 0x195   :  { %1415 = vmatmul.mubr.msk.bf16.vlgmr.msra.gmra.mrb[12].mxu0 %vm368_vm1, %v2051_v24 }
 0x196   :  { %1444 = vmatprep.mubr.msk.bf16.mxu0 %vm1828_vm2, %v1827_v55  ;;  %1429 = vmatpush3.bf16.msra.mxu0 %v1556_v9 }
 0x197   :  { %1423 = vmatpush3.bf16.msra.mxu1 %v1555_v41  ;;  %1430 = vmatprep.subr.bf16.mxu0 %v1827_v55  ;;  %v1323_v41 = vld [vmem:[%s2159_s12] ss:$0 sm:$0xff] }
 0x198   :  { %1448 = vmatprep.subr.bf16.mxu1 %v1827_v55 }
 0x19a   :  { %1425 = vmatmul.mubr.msk.bf16.vlgmr.msra.gmra.mrb[12].mxu1 %vm242_vm0, %v2045_v14  ;;  %v1314_v14 = vld [vmem:[%s2155_s8] ss:$0 sm:$0xff]  ;;  %1431 = vmatpush3.bf16.msra.mxu0 %v1557_v10 }
 0x19b   :  { %1464 = vmatprep.mubr.msk.bf16.mxu1 %vm1828_vm2, %v1827_v55  ;;  %1432 = vmatprep.subr.bf16.mxu0 %v1827_v55 }
 0x19c   :  { %1449 = vmatpush3.bf16.msra.mxu1 %v1564_v27 }
 0x19d   :  { %1450 = vmatprep.subr.bf16.mxu1 %v1827_v55 }
 0x19e   :  { %1433 = vmatpush3.bf16.msra.mxu0 %v1558_v11 }
 0x19f   :  { %1434 = vmatprep.subr.bf16.mxu0 %v1827_v55 }
 0x1a0   :  { %1451 = vmatpush3.bf16.msra.mxu1 %v1565_v28 }
 0x1a1   :  { %1452 = vmatprep.subr.bf16.mxu1 %v1827_v55 }
 0x1a2   :  { %1435 = vmatpush3.bf16.msra.mxu0 %v1559_v12 }
 0x1a3   :  { %1436 = vmatprep.subr.bf16.mxu0 %v1827_v55 }
 0x1a4   :  { %1453 = vmatpush3.bf16.msra.mxu1 %v1566_v29 }
 0x1a5   :  { %1454 = vmatprep.subr.bf16.mxu1 %v1827_v55 }
 0x1a6   :  { %1437 = vmatpush3.bf16.msra.mxu0 %v1560_v13 }
 0x1a7   :  { %1438 = vmatprep.subr.bf16.mxu0 %v1827_v55 }
 0x1a8   :  { %1455 = vmatpush3.bf16.msra.mxu1 %v1567_v30 }
 0x1a9   :  { %1456 = vmatprep.subr.bf16.mxu1 %v1827_v55 }
 0x1aa   :  { %1439 = vmatpush3.bf16.msra.mxu0 %v1561_v21 }
 0x1ab   :  { %1440 = vmatprep.subr.bf16.mxu0 %v1827_v55 }
 0x1ac   :  { %1457 = vmatpush3.bf16.msra.mxu1 %v1568_v31 }
 0x1ad   :  { %1458 = vmatprep.subr.bf16.mxu1 %v1827_v55 }
 0x1ae   :  { %1441 = vmatpush3.bf16.msra.mxu0 %v1562_v23 }
 0x1af   :  { %1442 = vmatprep.subr.bf16.mxu0 %v1827_v55 }
 0x1b0   :  { %1459 = vmatpush3.bf16.msra.mxu1 %v1569_v32 }
 0x1b1   :  { %1460 = vmatprep.subr.bf16.mxu1 %v1827_v55 }
 0x1b2   :  { %1443 = vmatpush3.bf16.msra.mxu0 %v1563_v26 }
 0x1b4   :  { %1461 = vmatpush3.bf16.msra.mxu1 %v1570_v39 }
 0x1b5   :  { %1462 = vmatprep.subr.bf16.mxu1 %v1827_v55 }
 0x1b8   :  { %1463 = vmatpush3.bf16.msra.mxu1 %v1571_v40 }
 0x260   :  { %v1357_v42 = vpop.f32.mrb[8].mxu0 }
 0x261   :  { %v1379_v43 = vpop.f32.mrb[8].mxu1  ;;  %v1358_v45 = vpop.f32.mrb[9].mxu0 }
 0x262   :  { %v1380_v46 = vpop.f32.mrb[9].mxu1  ;;  %v1359_v47 = vadd.f32 %v1358_v45, %v1357_v42  ;;  %v1360_v48 = vpop.f32.mrb[10].mxu0 }
 0x263   :  { %v1381_v24 = vadd.f32 %v1380_v46, %v1379_v43  ;;  %v1382_v49 = vpop.f32.mrb[10].mxu1  ;;  %v1361_v50 = vpop.f32.mrb[11].mxu0 }
 0x264   :  { %v1383_v51 = vpop.f32.mrb[11].mxu1  ;;  %v786_v52 = vadd.f32 %v1359_v47, %v1280_v44 }
 0x266   :  { %v826_v53 = vadd.f32 %v1381_v24, %v786_v52 }
 0x268   :  { %v1313_v54 = vmul.f32 -1.442695, %v826_v53  ;;  %v895_v56 = vpop.f32.mrb[12].mxu0 }
 0x269   :  { %v2090_v57 = vadd.f32 %v1314_v14, %v895_v56  ;;  %v1416_v58 = vpop.f32.mrb[13].mxu0 }
 0x26a   :  { %1572 = vpow2.f32 %v1313_v54  ;;  %v898_v59 = vpop.f32.mrb[14].mxu0 }
 0x26b   :  { %v1417_v61 = vpop.f32.mrb[15].mxu0  ;;  %v972_v62 = vmul.f32 %v2090_v57, %v2090_v57 }
 0x26d   :  { %v966_v63 = vpop.f32.mrb[12].mxu1  ;;  %973 = vadd.xlane.f32.xlu0 %v972_v62 }
 0x26e   :  { %v2097_v0 = vadd.f32 %v1318_v60, %v966_v63  ;;  %v1426_v1 = vpop.f32.mrb[13].mxu1 }
 0x26f   :  { %v969_v2 = vpop.f32.mrb[14].mxu1 }
 0x270   :  { %v1427_v3 = vpop.f32.mrb[15].mxu1  ;;  %v977_v4 = vmul.f32 %v2097_v0, %v2097_v0 }
 0x272   :  { %978 = vadd.xlane.f32.xlu0 %v977_v4 }
 0x274   :  { %v1573_v5 = vpop.eup %1572 }
 0x275   :  { %v834_v6 = vadd.f32 1.0, %v1573_v5 }
 0x277   :  { %1574 = vrcp.f32 %v834_v6 }
 0x281   :  { %v1575_v7 = vpop.eup %1574 }
 0x282   :  { %837 = vst [vmem:[#allocation17] sm:$0xff] %v1575_v7 }
 0x2fa   :  { %v974_v15 = vpop.xlane.xlu0 %973 }
 0x2fb   :  { %v975_v16 = vmax.f32 %v974_v15, 1e-24 }
 0x2fd   :  { %1576 = vrsqrt.f32 %v975_v16 }
 0x2ff   :  { %v979_v17 = vpop.xlane.xlu0 %978 }
 0x300   :  { %v980_v18 = vmax.f32 %v979_v17, 1e-24 }
 0x302   :  { %1578 = vrsqrt.f32 %v980_v18 }
 0x307   :  { %v1577_v19 = vpop.eup %1576 }
 0x308   :  { %v982_v20 = vmul.f32 %v1577_v19, %v1575_v7 }
 0x30a   :  { %985 = vperm.xlu1 %1486, %v982_v20  }
 0x30c   :  { %v1579_v22 = vpop.eup %1578 }
 0x30d   :  { %v989_v25 = vmul.f32 %v1579_v22, %v1575_v7 }
 0x30e   :  { %1487 = vset.pattern.permute.xlu1 %v1829_v8 }
 0x30f   :  { %992 = vperm.xlu1 %1487, %v989_v25  }
 0x389   :  { %v986_v33 = vpop.permute.xlu1 %985 }
 0x38a   :  { %v988_v35 = vmul.f32 %v986_v33, %v2090_v57 }
 0x38e   :  { %v993_v34 = vpop.permute.xlu1 %992 }
 0x38f   :  { %v995_v36 = vmul.f32 %v993_v34, %v2097_v0 }
 0x391   :  { %v996_v37 = vadd.f32 %v995_v36, %v988_v35 }
 0x393   :  { %v997_v38 = vpack.c.bf16 %v996_v37, %v996_v37 }
 0x395   :  { %1445 = vmatmul.mubr.bf16.vlgmr.msra.gmra.mrb[16].mxu0 %v997_v38 }
 0x468   :  { %v1103_v42 = vpop.f32.mrb[16].mxu0 }
 0x469   :  { %v1104_v43 = vadd.f32 %v1323_v41, %v1103_v42  ;;  %v1446_v44 = vpop.f32.mrb[17].mxu0 }
 0x46a   :  { %v1106_v45 = vpop.f32.mrb[18].mxu0 }
 0x46b   :  { %v1109_v46 = vmax.f32 %v1104_v43, 0.0  ;;  %v1447_v47 = vpop.f32.mrb[19].mxu0 }
 0x46d   :  { %v1110_v24 = vpack.c.bf16 %v1109_v46, %v1109_v46 }
 0x46f   :  { %1465 = vmatmul.mubr.bf16.vlgmr.msra.gmra.mrb[16].mxu1 %v1110_v24 }
 0x470   :  { %1767 = shalt.err (!%p1764_p12)
}
 0x471   :  { %s1768_s22 = scalar_lea.hbm %s2163_s16, 128 }
 0x472   :  { %p1769_p13 = scmp.ne.s32.totalorder %s2163_s16, %s1768_s22  ;;  %p1772_p0 = scmp.lt.u32.totalorder %s1768_s22, %s2163_s16 }
 0x474   :  { %p1774_p1 = pnand %p1772_p0, %p1769_p13 }
 0x476   :  { %1777 = shalt.err (!%p1774_p1)
}
 0x477   :  { %1242 = dma.vmem_to_hbm [thread:$0]  %s1240_s26, 128, %s2163_s16, [#allocation18]   ;;  %v1332_v55 = vld [vmem:[%s2161_s14] ss:$0 sm:$0xff] }
 0x478   :  { %s1831_s4 = smov [#allocation16]  }
 0x479   :  { %s1229_s2 = sshll.u32 %s1831_s4, 4  ;;  %s1230_s2 = int_to_ptr.vmem [resolvable:$true] %s1229_s2 }
 0x47a   :  { %s1778_s20 = scalar_lea.vmem %s1230_s2, 128  ;;  %p1783_p3 = scmp.lt.s32.totalorder %s1230_s2, %s1230_s2 }
 0x47b   :  { %p1779_p2 = scmp.ne.s32.totalorder %s1230_s2, %s1778_s20  ;;  %p1784_p4 = scmp.lt.s32.totalorder %s1778_s20, %s1778_s20 }
 0x47d   :  { %p1785_p5 = por %p1784_p4, %p1783_p3 }
 0x47f   :  { %p1786_p6 = pnand %p1785_p5, %p1779_p2 }
 0x542   :  { %v1216_v48 = vpop.f32.mrb[16].mxu1 }
 0x543   :  { %v1217_v49 = vadd.f32 %v1332_v55, %v1216_v48  ;;  %v1466_v50 = vpop.f32.mrb[17].mxu1 }
 0x544   :  { %v1219_v51 = vpop.f32.mrb[18].mxu1 }
 0x545   :  { %1222 = vst [vmem:[#allocation16] sm:$0xff] %v1217_v49  ;;  %v1467_v52 = vpop.f32.mrb[19].mxu1 }
 0x546   :  { %1789 = shalt.err (!%p1786_p6)
}
 0x547   :  { %s1790_s14 = scalar_lea.hbm %s2162_s15, 128 }
 0x548   :  { %p1791_p7 = scmp.ne.s32.totalorder %s2162_s15, %s1790_s14  ;;  %p1794_p8 = scmp.lt.u32.totalorder %s1790_s14, %s2162_s15 }
 0x54a   :  { %p1796_p9 = pnand %p1794_p8, %p1791_p7 }
 0x54c   :  { %1799 = shalt.err (!%p1796_p9)
}
 0x54d   :  { %1232 = dma.vmem_to_hbm [thread:$0]  %s1230_s2, 128, %s2162_s15, [#allocation4]  }
 0x54e   :  { %1810 = dma.done.wait [#allocation4], 128  }
 0x54f   :  { %1811 = vsyncadd [#allocation4], 4294967168 }
 0x550   :  { %1812 = dma.done.wait [#allocation18], 128  }
 0x551   :  { %1813 = vsyncadd [#allocation18], 4294967168 }
 0x552   :  { %1249 = vsyncpa [#allocation3], 1 }
 0x553   :  { %1250 = vsyncpa [#allocation6], 1 }
 0x554   :  { %1251 = vsyncpa [#allocation9], 1 }
 0x555   :  { %1252 = vsyncpa [#allocation12], 1 }
 0x556   :  { %1253 = vsyncpa [#allocation15], 1 }
 0x557   :  { %1254 = vsyncpa [#allocation4], 1 }
 0x558   :  { %1255 = vsyncpa [#allocation18], 1 }

</bundles_post_ra>
